<compile_context>
chip_gen: v5e
topology: v5e:2x2
jax: 0.10.0
libtpu: 0.0.40
codegen_flags: <defaults>
</compile_context>

<pallas_src>
import functools

import jax
import jax.numpy as jnp
from jax.experimental import pallas as pl
from jax.experimental.pallas import tpu as pltpu


def gat_project_kernel(h_ref, waug_ref, wh_ref, whp_ref, *, f_out):
    """Per row-tile: single bf16 MXU matmul  h @ [W | W@a1 | W@a2 | 0...]."""
    h = h_ref[...].astype(jnp.bfloat16)                                  # (TM, F_in)
    wh = jnp.dot(h, waug_ref[...], preferred_element_type=jnp.float32)   # (TM, F_pad) f32
    whp_ref[...] = wh[:, f_out:f_out + 2]       # f32 attention projections [Wh@a1 | Wh@a2]
    wh_ref[...] = wh.astype(jnp.bfloat16)       # (columns f_out:f_out+2 are sliced off later)


def gat_attention_kernel(wh1_ref, wh2t_ref, adj_ref, wh_ref, out_ref, *,
                         alpha, concat, exp_in_bf16):
    """Per row-tile: masked row-softmax over neighbors + att @ Wh + ELU."""
    # attention logits e[i,j] = LeakyReLU(wh1[i] + wh2[j])  -- f32
    e = wh1_ref[...] + wh2t_ref[...]                     # (TM,1)+(1,N) -> (TM,N)
    if 0.0 <= alpha <= 1.0:
        e = jnp.maximum(e, alpha * e)                    # LeakyReLU, 1 VPU op
    else:
        e = jnp.where(e > 0.0, e, alpha * e)
    logits = jnp.where(adj_ref[...] > 0, e, -9e15)       # compare int8 directly
    # numerically stable row softmax (dim=1), normalization deferred past the matmul
    m = jnp.max(logits, axis=1, keepdims=True)
    x = logits - m
    if exp_in_bf16:                                      # bf16 EUP path (v6e/v7x)
        p = jnp.exp(x.astype(jnp.bfloat16))              # (TM,N) bf16, values in [0,1]
        s = jnp.sum(p.astype(jnp.float32), axis=1, keepdims=True)   # f32 row sum
        p_mm = p
    else:                                                # f32 path (v5e: no bf16 VPU/EUP)
        p = jnp.exp(x)
        s = jnp.sum(p, axis=1, keepdims=True)
        p_mm = p.astype(jnp.bfloat16)
    # F.dropout(..., training=False) is the identity -> no-op.
    hp = jnp.dot(p_mm, wh_ref[...], preferred_element_type=jnp.float32)  # (TM, F_pad) f32
    hp = hp * pl.reciprocal(s, approx=True)              # deferred normalization (EUP)
    if concat:
        hp = jnp.where(hp > 0.0, hp, jnp.expm1(hp))      # ELU (expm1 for accuracy near 0)
    out_ref[...] = hp


def _pick_row_tile(n, tm_max):
    """Largest multiple of 32 that divides n (<= tm_max); else the full extent."""
    tm = min(tm_max, n) - (min(tm_max, n) % 32)
    while tm >= 32 and n % tm:
        tm -= 32
    return tm if tm >= 32 and n % tm == 0 else n


def _bf16_transcendentals_supported():
    """bf16 exp is a win on v6e/v7x; v5e (and older) have no bf16 VPU/EUP."""
    try:
        kind = jax.devices()[0].device_kind.lower()
    except Exception:
        return False
    return not any(tag in kind for tag in ("v2", "v3", "v4", "v5"))


def gat_layer_forward(h, w, a, adj, *, alpha=0.2, concat=True,
                      tm_project=512, tm_attend=128,
                      vmem_limit_bytes=None, exp_in_bf16=None):
    """GATLayer.forward (eval mode).
    h:(N,F_in) f32, w:(F_in,F_out), a:(2*F_out,1), adj:(N,N) (nonzero == edge; int8 preferred)."""
    n, f_in = h.shape
    f_out = w.shape[1]
    assert adj.shape == (n, n) and a.shape == (2 * f_out, 1)

    if exp_in_bf16 is None:
        exp_in_bf16 = _bf16_transcendentals_supported()

    # Lane-dense padding of the feature dim; two extra columns hold W@a1 and W@a2
    # so the a-projection rides along the single bf16 matmul in kernel 1.
    f_pad = ((f_out + 2 + 127) // 128) * 128
    w_f32 = w.astype(jnp.float32)
    a_f32 = a.astype(jnp.float32).reshape(2 * f_out)
    wa = w_f32 @ jnp.stack([a_f32[:f_out], a_f32[f_out:]], axis=1)        # (F_in, 2)
    w_aug = (jnp.zeros((f_in, f_pad), jnp.float32)
             .at[:, :f_out].set(w_f32)
             .at[:, f_out:f_out + 2].set(wa)).astype(jnp.bfloat16)
    adj_i8 = adj if adj.dtype == jnp.int8 else (adj != 0).astype(jnp.int8)
    h = h.astype(jnp.float32)

    # Decoupled row tiles: kernel 1 moves little data per row -> big tile amortizes the
    # ~0.35us/step grid overhead; kernel 2's working set is O(TM*N) -> keep TM modest.
    tm1 = _pick_row_tile(n, tm_project)
    tm2 = _pick_row_tile(n, tm_attend)

    # Kernel 1: fused projection Wh_aug = h @ [W | W@a1 | W@a2 | 0], row-tiled, parallel grid.
    wh_bf16, whp = pl.pallas_call(
        functools.partial(gat_project_kernel, f_out=f_out),
        out_shape=(jax.ShapeDtypeStruct((n, f_pad), jnp.bfloat16),
                   jax.ShapeDtypeStruct((n, 2), jnp.float32)),
        grid=(n // tm1,),
        in_specs=[pl.BlockSpec((tm1, f_in), lambda i: (i, 0)),      # h row tile
                  pl.BlockSpec((f_in, f_pad), lambda i: (0, 0))],   # W_aug (resident, bf16)
        out_specs=(pl.BlockSpec((tm1, f_pad), lambda i: (i, 0)),
                   pl.BlockSpec((tm1, 2), lambda i: (i, 0))),
        compiler_params=pltpu.CompilerParams(dimension_semantics=("parallel",)),
    )(h, w_aug)

    wh1 = whp[:, 0:1]        # (N, 1)  query-side term
    wh2_row = whp[:, 1:2].T  # (1, N)  key-side term, computed once (hoisted out of tiles)

    # Kernel 2: masked softmax + aggregation, row-tiled, int8 adjacency double-buffered.
    out_pad = pl.pallas_call(
        functools.partial(gat_attention_kernel, alpha=float(alpha),
                          concat=bool(concat), exp_in_bf16=bool(exp_in_bf16)),
        out_shape=jax.ShapeDtypeStruct((n, f_pad), jnp.float32),
        grid=(n // tm2,),
        in_specs=[pl.BlockSpec((tm2, 1), lambda i: (i, 0)),         # wh1 row tile
                  pl.BlockSpec((1, n), lambda i: (0, 0)),           # wh2^T (resident)
                  pl.BlockSpec((tm2, n), lambda i: (i, 0)),         # adj row tile (int8)
                  pl.BlockSpec((n, f_pad), lambda i: (0, 0))],      # Wh (bf16, resident)
        out_specs=pl.BlockSpec((tm2, f_pad), lambda i: (i, 0)),
        compiler_params=pltpu.CompilerParams(
            dimension_semantics=("parallel",),
            # Raise (e.g. 64<<20 on v6e, keep <=~52<<20 on v7x) for >=512-row adj tiles
            # at large N; the per-step working set is O(TM*(N+F_pad)).
            vmem_limit_bytes=vmem_limit_bytes),
    )(wh1, wh2_row, adj_i8, wh_bf16)
    # Columns >= f_out (incl. the two folded projection columns) are sliced off here.
    return out_pad[:, :f_out]


def xavier_uniform(key, shape, gain):
    fan_in, fan_out = shape[0], shape[1]
    bound = gain * jnp.sqrt(6.0 / (fan_in + fan_out))
    return jax.random.uniform(key, shape, jnp.float32, minval=-bound, maxval=bound)


if __name__ == "__main__":
    # Small GAT problem: N nodes (2 row tiles in kernel 2), 32 -> 32 features.
    N, F_IN, F_OUT = 256, 32, 32
    ALPHA = 0.2  # LeakyReLU negative slope

    key = jax.random.PRNGKey(0)
    k_h, k_adj, k_w, k_a = jax.random.split(key, 4)

    h = jax.random.normal(k_h, (N, F_IN), dtype=jnp.float32)
    # sparse-ish binary adjacency with self loops, shipped as int8
    adj = (jax.random.uniform(k_adj, (N, N)) < 0.15)
    adj = jnp.logical_or(adj, jnp.eye(N, dtype=bool)).astype(jnp.int8)
    # deterministic parameter init matching nn.init.xavier_uniform_(gain=1.414)
    w = xavier_uniform(k_w, (F_IN, F_OUT), gain=1.414)
    a = xavier_uniform(k_a, (2 * F_OUT, 1), gain=1.414)

    out = gat_layer_forward(h, w, a, adj, alpha=ALPHA)
    jax.block_until_ready(out)
    assert out.shape == (N, F_OUT)

    # pure-JAX f32 reference (PyTorch eval-mode semantics); kernel uses bf16 MXU inputs,
    # so compare with a loose tolerance.
    wh = h @ w
    e = wh @ a[:F_OUT] + (wh @ a[F_OUT:]).T
    e = jnp.where(e > 0, e, ALPHA * e)
    logits = jnp.where(adj > 0, e, -9e15)
    att = jax.nn.softmax(logits, axis=1)
    hp = att @ wh
    ref = jnp.where(hp > 0, hp, jnp.expm1(hp))
    assert jnp.allclose(out, ref, atol=5e-2, rtol=5e-2), "mismatch vs reference"

    print("KERNEL_OK")
</pallas_src>

<mosaic_0001>
module attributes {stable_mosaic.version = 11 : i64} {
  func.func @gat_project_kernel(%arg0: i32, %arg1: memref<256x32xf32, #tpu.memory_space<vmem>>, %arg2: memref<32x128xbf16, #tpu.memory_space<vmem>>, %arg3: memref<256x128xbf16, #tpu.memory_space<vmem>>, %arg4: memref<256x2xf32, #tpu.memory_space<vmem>>) attributes {dimension_semantics = [#tpu.dimension_semantics<parallel>], iteration_bounds = array<i64: 1>, scalar_prefetch = 0 : i64, scratch_operands = 0 : i64, tpu.core_type = #tpu.core_type<tc>, window_params = [{transform_indices = @transform_0, window_bounds = array<i64: 256, 32>}, {pipeline_mode = #tpu.pipeline_mode<synchronous>, transform_indices = @transform_1, window_bounds = array<i64: 32, 128>}, {transform_indices = @transform_2, window_bounds = array<i64: 256, 128>}, {transform_indices = @transform_3, window_bounds = array<i64: 256, 2>}]} {
    %c0 = arith.constant 0 : index
    %c0_0 = arith.constant 0 : index
    %0 = vector.load %arg1[%c0, %c0_0] : memref<256x32xf32, #tpu.memory_space<vmem>>, vector<256x32xf32>
    %1 = arith.truncf %0 : vector<256x32xf32> to vector<256x32xbf16>
    %c0_1 = arith.constant 0 : index
    %c0_2 = arith.constant 0 : index
    %2 = vector.load %arg2[%c0_1, %c0_2] : memref<32x128xbf16, #tpu.memory_space<vmem>>, vector<32x128xbf16>
    %cst = arith.constant dense<0.000000e+00> : vector<256x128xf32>
    %3 = tpu.matmul %1, %2, %cst {dimension_numbers = #tpu.dot_dimension_numbers<[1], [0], [0], [1], [0, 0, 1, 1], [], []>} : vector<256x32xbf16>, vector<32x128xbf16>, vector<256x128xf32> -> vector<256x128xf32>
    %4 = vector.extract_strided_slice %3 {offsets = [0, 32], sizes = [256, 2], strides = [1, 1]} : vector<256x128xf32> to vector<256x2xf32>
    %c0_3 = arith.constant 0 : index
    %c0_4 = arith.constant 0 : index
    %5 = vector.load %arg4[%c0_3, %c0_4] : memref<256x2xf32, #tpu.memory_space<vmem>>, vector<256x2xf32>
    tpu.vector_store %arg4[%c0_3, %c0_4], %4 {strides = array<i32>} : memref<256x2xf32, #tpu.memory_space<vmem>>, vector<256x2xf32>,
    %6 = arith.truncf %3 : vector<256x128xf32> to vector<256x128xbf16>
    %c0_5 = arith.constant 0 : index
    %c0_6 = arith.constant 0 : index
    %7 = vector.load %arg3[%c0_5, %c0_6] : memref<256x128xbf16, #tpu.memory_space<vmem>>, vector<256x128xbf16>
    tpu.vector_store %arg3[%c0_5, %c0_6], %6 {strides = array<i32>} : memref<256x128xbf16, #tpu.memory_space<vmem>>, vector<256x128xbf16>,
    return
  }
  func.func @transform_0(%arg0: i32) -> (i32, i32) {
    %c0_i32 = arith.constant 0 : i32
    %c0_i32_0 = arith.constant 0 : i32
    return %arg0, %c0_i32 : i32, i32
  }
  func.func @transform_1(%arg0: i32) -> (i32, i32) {
    %c0_i32 = arith.constant 0 : i32
    %c0_i32_0 = arith.constant 0 : i32
    %c0_i32_1 = arith.constant 0 : i32
    return %c0_i32, %c0_i32_0 : i32, i32
  }
  func.func @transform_2(%arg0: i32) -> (i32, i32) {
    %c0_i32 = arith.constant 0 : i32
    %c0_i32_0 = arith.constant 0 : i32
    return %arg0, %c0_i32 : i32, i32
  }
  func.func @transform_3(%arg0: i32) -> (i32, i32) {
    %c0_i32 = arith.constant 0 : i32
    %c0_i32_0 = arith.constant 0 : i32
    return %arg0, %c0_i32 : i32, i32
  }
}

</mosaic_0001>

<bundles_post_ra>
// kernel: tpu_custom_call.1
= control target key start
LH: loop header
LB: loop body
LE: loop exit
PB: predicated region body
PF: predicated region fallthrough
CT: control target
= control target key end

     0   :  { %vm79_vm0 = vcmask 261120   ;;  %s926_s0 = inlined_call_operand.vmem [shape: f32[256,32], index: 0, kind: input, shape index: {}]   ;;  %s927_s1 = inlined_call_operand.vmem [shape: bf16[32,128], index: 1, kind: input, shape index: {}]   ;;  %s928_s2 = inlined_call_operand.hbm [shape: bf16[256,128], index: 2, kind: output, shape index: {0}]   ;;  %s929_s3 = inlined_call_operand.vmem [shape: f32[256,2], index: 3, kind: output, shape index: {1}]  }
   0x1   :  { %v489_v0 = vld [vmem:[%s927_s1 + $0x8] sm:$0xff]  ;;  %v488_v1 = vld [vmem:[%s927_s1] sm:$0xff] }
   0x2   :  { %v15_v2 = vld [vmem:[%s926_s0] sm:$0xff]  ;;  %v16_v3 = vld [vmem:[%s926_s0 + $0x8] sm:$0xff]  ;;  %134 = vmatpush.bf16.msra.mxu0 %v489_v0  ;;  %586 = vmatpush.bf16.msra.mxu2 %v489_v0 }
   0x3   :  { %v31_v4 = vld [vmem:[%s926_s0 + $0x80] sm:$0xff]  ;;  %v32_v5 = vld [vmem:[%s926_s0 + $0x88] sm:$0xff]  ;;  %587 = vmatpush.bf16.msra.mxu3 %v489_v0  ;;  %585 = vmatpush.bf16.msra.mxu1 %v489_v0  ;;  %v47_v10 = vpack.c.bf16 %v16_v3, %v15_v2 }
   0x4   :  { %v39_v6 = vld [vmem:[%s926_s0 + $0xc0] sm:$0xff]  ;;  %v40_v7 = vld [vmem:[%s926_s0 + $0xc8] sm:$0xff]  ;;  %v55_v11 = vpack.c.bf16 %v32_v5, %v31_v4 }
   0x5   :  { %v23_v8 = vld [vmem:[%s926_s0 + $0x40] sm:$0xff]  ;;  %v24_v9 = vld [vmem:[%s926_s0 + $0x48] sm:$0xff]  ;;  %v59_v12 = vpack.c.bf16 %v40_v7, %v39_v6 }
   0x6   :  { %135 = vmatpush.bf16.msra.mxu0 %v488_v1  ;;  %589 = vmatpush.bf16.msra.mxu2 %v488_v1  ;;  %v51_v13 = vpack.c.bf16 %v24_v9, %v23_v8 }
   0x7   :  { %9 = vsyncpa [#allocation3], 0  ;;  %590 = vmatpush.bf16.msra.mxu3 %v488_v1  ;;  %588 = vmatpush.bf16.msra.mxu1 %v488_v1  ;;  %v17_v14 = vld [vmem:[%s926_s0 + $0x10] sm:$0xff]  ;;  %v18_v15 = vld [vmem:[%s926_s0 + $0x18] sm:$0xff]  ;;  %s621_s24 = smov 96   ;;  %s448_s27 = sshll.u32 %s928_s2, 4  ;;  %s449_s27 = int_to_ptr.hbm [resolvable:$true] %s448_s27 }
   0x8   :  { %v41_v16 = vld [vmem:[%s926_s0 + $0xd0] sm:$0xff]  ;;  %v34_v18 = vld [vmem:[%s926_s0 + $0x98] sm:$0xff]  ;;  %v48_v22 = vpack.c.bf16 %v18_v15, %v17_v14  ;;  %v19_v26 = vld [vmem:[%s926_s0 + $0x20] sm:$0xff]  ;;  %s623_s28 = smov 64   ;;  %s624_s29 = smov 4   ;;  %vm345_vm1 = vcmask 15360  }
   0x9   :  { %472 = vmatmul.msk.bf16.vlgmr.msra.gmra.mxu0 %vm79_vm0, %v47_v10  ;;  %480 = vmatmul.msk.bf16.vlgmr.msra.gmra.mxu2 %vm79_vm0, %v55_v11  ;;  %v33_v17 = vld [vmem:[%s926_s0 + $0x90] sm:$0xff]  ;;  %v42_v19 = vld [vmem:[%s926_s0 + $0xd8] sm:$0xff]  ;;  %v20_v27 = vld [vmem:[%s926_s0 + $0x28] sm:$0xff] }
   0xa   :  { %484 = vmatmul.msk.bf16.vlgmr.msra.gmra.mxu3 %vm79_vm0, %v59_v12  ;;  %476 = vmatmul.msk.bf16.vlgmr.msra.gmra.mxu1 %vm79_vm0, %v51_v13  ;;  %v25_v20 = vld [vmem:[%s926_s0 + $0x50] sm:$0xff]  ;;  %v26_v21 = vld [vmem:[%s926_s0 + $0x58] sm:$0xff]  ;;  %v56_v23 = vpack.c.bf16 %v34_v18, %v33_v17  ;;  %v60_v24 = vpack.c.bf16 %v42_v19, %v41_v16  ;;  %v35_v28 = vld [vmem:[%s926_s0 + $0xa0] sm:$0xff]  ;;  %v49_v34 = vpack.c.bf16 %v20_v27, %v19_v26 }
   0xb   :  { %v52_v25 = vpack.c.bf16 %v26_v21, %v25_v20  ;;  %v36_v29 = vld [vmem:[%s926_s0 + $0xa8] sm:$0xff]  ;;  %v43_v30 = vld [vmem:[%s926_s0 + $0xe0] sm:$0xff]  ;;  %v37_v38 = vld [vmem:[%s926_s0 + $0xb0] sm:$0xff] }
   0xc   :  { %v44_v31 = vld [vmem:[%s926_s0 + $0xe8] sm:$0xff]  ;;  %v27_v32 = vld [vmem:[%s926_s0 + $0x60] sm:$0xff]  ;;  %v57_v35 = vpack.c.bf16 %v36_v29, %v35_v28  ;;  %v38_v39 = vld [vmem:[%s926_s0 + $0xb8] sm:$0xff] }
   0xd   :  { %v28_v33 = vld [vmem:[%s926_s0 + $0x68] sm:$0xff]  ;;  %v61_v36 = vpack.c.bf16 %v44_v31, %v43_v30  ;;  %v21_v40 = vld [vmem:[%s926_s0 + $0x30] sm:$0xff]  ;;  %v22_v41 = vld [vmem:[%s926_s0 + $0x38] sm:$0xff]  ;;  %v58_v46 = vpack.c.bf16 %v38_v39, %v37_v38 }
   0xe   :  { %v53_v37 = vpack.c.bf16 %v28_v33, %v27_v32  ;;  %v29_v42 = vld [vmem:[%s926_s0 + $0x70] sm:$0xff]  ;;  %v30_v43 = vld [vmem:[%s926_s0 + $0x78] sm:$0xff]  ;;  %v50_v47 = vpack.c.bf16 %v22_v41, %v21_v40 }
   0xf   :  { %v45_v44 = vld [vmem:[%s926_s0 + $0xf0] sm:$0xff]  ;;  %v46_v45 = vld [vmem:[%s926_s0 + $0xf8] sm:$0xff]  ;;  %v54_v48 = vpack.c.bf16 %v30_v43, %v29_v42  ;;  %s622_s0 = smov [#allocation2]  }
  0x10   :  { %v62_v49 = vpack.c.bf16 %v46_v45, %v45_v44  ;;  %s446_s1 = sshll.u32 %s622_s0, 4  ;;  %s447_s1 = int_to_ptr.vmem [resolvable:$true] %s446_s1 }
  0x19   :  { %473 = vmatmul.msk.bf16.gmra.mxu0 %vm79_vm0, %v48_v22  ;;  %481 = vmatmul.msk.bf16.gmra.mxu2 %vm79_vm0, %v56_v23 }
  0x1a   :  { %485 = vmatmul.msk.bf16.gmra.mxu3 %vm79_vm0, %v60_v24  ;;  %477 = vmatmul.msk.bf16.gmra.mxu1 %vm79_vm0, %v52_v25 }
  0x29   :  { %474 = vmatmul.msk.bf16.gmra.mxu0 %vm79_vm0, %v49_v34  ;;  %482 = vmatmul.msk.bf16.gmra.mxu2 %vm79_vm0, %v57_v35 }
  0x2a   :  { %486 = vmatmul.msk.bf16.gmra.mxu3 %vm79_vm0, %v61_v36  ;;  %478 = vmatmul.msk.bf16.gmra.mxu1 %vm79_vm0, %v53_v37 }
  0x39   :  { %483 = vmatmul.msk.bf16.gmra.mxu2 %vm79_vm0, %v58_v46  ;;  %475 = vmatmul.msk.bf16.gmra.mxu0 %vm79_vm0, %v50_v47 }
  0x3a   :  { %479 = vmatmul.msk.bf16.gmra.mxu1 %vm79_vm0, %v54_v48  ;;  %487 = vmatmul.msk.bf16.gmra.mxu3 %vm79_vm0, %v62_v49 }
  0x86   :  { %v137_v50 = vpop.f32.mrf.mxu0 }
  0x87   :  { %249 = vrot.lane.b32.xlu0 %v137_v50, %s621_s24  ;;  %v157_v51 = vpop.f32.mrf.mxu1 }
  0x88   :  { %265 = vrot.lane.b32.xlu2 %v157_v51, %s621_s24 }
  0x8c   :  { %v177_v52 = vpop.f32.mrf.mxu2 }
  0x8d   :  { %v197_v53 = vpop.f32.mrf.mxu3  ;;  %281 = vrot.lane.b32.xlu1 %v177_v52, %s621_s24 }
  0x8e   :  { %v139_v54 = vpop.f32.mrf.mxu0 }
  0x8f   :  { %v493_v55 = vpack.c.bf16 %v139_v54, %v137_v50  ;;  %297 = vrot.lane.b32.xlu0 %v197_v53, %s621_s24  ;;  %v159_v56 = vpop.f32.mrf.mxu1 }
  0x90   :  { %v513_v57 = vpack.c.bf16 %v159_v56, %v157_v51 }
  0x91   :  { %494 = vst [vmem:[#allocation2] sm:$0xff] %v493_v55  }
  0x92   :  { %573 = vst [vmem:[#allocation2 + $0x20] sm:$0xff] %v513_v57  }
  0x94   :  { %v179_v58 = vpop.f32.mrf.mxu2 }
  0x95   :  { %v533_v59 = vpack.c.bf16 %v179_v58, %v177_v52  ;;  %v199_v60 = vpop.f32.mrf.mxu3  ;;  %283 = vrot.lane.b32.xlu2 %v179_v58, %s621_s24 }
  0x96   :  { %v553_v61 = vpack.c.bf16 %v199_v60, %v197_v53  ;;  %299 = vrot.lane.b32.xlu1 %v199_v60, %s621_s24  ;;  %v142_v62 = vpop.f32.mrf.mxu0 }
  0x97   :  { %577 = vst [vmem:[#allocation2 + $0x40] sm:$0xff] %v533_v59   ;;  %251 = vrot.lane.b32.xlu0 %v139_v54, %s621_s24  ;;  %v162_v63 = vpop.f32.mrf.mxu1 }
  0x98   :  { %581 = vst [vmem:[#allocation2 + $0x60] sm:$0xff] %v553_v61  }
  0x9c   :  { %v182_v0 = vpop.f32.mrf.mxu2 }
  0x9d   :  { %v202_v1 = vpop.f32.mrf.mxu3 }
  0x9e   :  { %301 = vrot.lane.b32.xlu2 %v202_v1, %s621_s24  ;;  %253 = vrot.lane.b32.xlu1 %v142_v62, %s621_s24  ;;  %v144_v2 = vpop.f32.mrf.mxu0 }
  0x9f   :  { %v498_v3 = vpack.c.bf16 %v144_v2, %v142_v62  ;;  %267 = vrot.lane.b32.xlu0 %v159_v56, %s621_s24  ;;  %v164_v4 = vpop.f32.mrf.mxu1 }
  0xa0   :  { %v518_v5 = vpack.c.bf16 %v164_v4, %v162_v63 }
  0xa1   :  { %570 = vst [vmem:[#allocation2 + $0x8] sm:$0xff] %v498_v3  }
  0xa2   :  { %574 = vst [vmem:[#allocation2 + $0x28] sm:$0xff] %v518_v5  }
  0xa4   :  { %v184_v6 = vpop.f32.mrf.mxu2 }
  0xa5   :  { %v538_v7 = vpack.c.bf16 %v184_v6, %v182_v0  ;;  %v204_v8 = vpop.f32.mrf.mxu3 }
  0xa6   :  { %271 = vrot.lane.b32.xlu2 %v164_v4, %s621_s24  ;;  %269 = vrot.lane.b32.xlu1 %v162_v63, %s621_s24  ;;  %v147_v9 = vpop.f32.mrf.mxu0  ;;  %v558_v10 = vpack.c.bf16 %v204_v8, %v202_v1 }
  0xa7   :  { %285 = vrot.lane.b32.xlu0 %v182_v0, %s621_s24  ;;  %578 = vst [vmem:[#allocation2 + $0x48] sm:$0xff] %v538_v7   ;;  %v167_v11 = vpop.f32.mrf.mxu1 }
  0xa8   :  { %582 = vst [vmem:[#allocation2 + $0x68] sm:$0xff] %v558_v10  }
  0xac   :  { %v187_v12 = vpop.f32.mrf.mxu2 }
  0xad   :  { %v207_v13 = vpop.f32.mrf.mxu3 }
  0xae   :  { %255 = vrot.lane.b32.xlu1 %v144_v2, %s621_s24  ;;  %257 = vrot.lane.b32.xlu2 %v147_v9, %s621_s24  ;;  %v149_v14 = vpop.f32.mrf.mxu0 }
  0xaf   :  { %303 = vrot.lane.b32.xlu0 %v204_v8, %s621_s24  ;;  %v503_v15 = vpack.c.bf16 %v149_v14, %v147_v9  ;;  %v169_v16 = vpop.f32.mrf.mxu1 }
  0xb0   :  { %v523_v17 = vpack.c.bf16 %v169_v16, %v167_v11 }
  0xb1   :  { %571 = vst [vmem:[#allocation2 + $0x10] sm:$0xff] %v503_v15  }
  0xb2   :  { %575 = vst [vmem:[#allocation2 + $0x30] sm:$0xff] %v523_v17  }
  0xb4   :  { %v189_v18 = vpop.f32.mrf.mxu2 }
  0xb5   :  { %v543_v19 = vpack.c.bf16 %v189_v18, %v187_v12  ;;  %v209_v20 = vpop.f32.mrf.mxu3 }
  0xb6   :  { %287 = vrot.lane.b32.xlu1 %v184_v6, %s621_s24  ;;  %289 = vrot.lane.b32.xlu2 %v187_v12, %s621_s24  ;;  %v563_v21 = vpack.c.bf16 %v209_v20, %v207_v13  ;;  %v152_v22 = vpop.f32.mrf.mxu0 }
  0xb7   :  { %273 = vrot.lane.b32.xlu0 %v167_v11, %s621_s24  ;;  %579 = vst [vmem:[#allocation2 + $0x50] sm:$0xff] %v543_v19   ;;  %v172_v23 = vpop.f32.mrf.mxu1 }
  0xb8   :  { %583 = vst [vmem:[#allocation2 + $0x70] sm:$0xff] %v563_v21  }
  0xbc   :  { %v192_v24 = vpop.f32.mrf.mxu2 }
  0xbd   :  { %v212_v25 = vpop.f32.mrf.mxu3 }
  0xbe   :  { %305 = vrot.lane.b32.xlu1 %v207_v13, %s621_s24  ;;  %259 = vrot.lane.b32.xlu2 %v149_v14, %s621_s24  ;;  %v154_v26 = vpop.f32.mrf.mxu0 }
  0xbf   :  { %291 = vrot.lane.b32.xlu0 %v189_v18, %s621_s24  ;;  %v508_v27 = vpack.c.bf16 %v154_v26, %v152_v22  ;;  %v174_v28 = vpop.f32.mrf.mxu1 }
  0xc0   :  { %v528_v29 = vpack.c.bf16 %v174_v28, %v172_v23 }
  0xc1   :  { %572 = vst [vmem:[#allocation2 + $0x18] sm:$0xff] %v508_v27  }
  0xc2   :  { %576 = vst [vmem:[#allocation2 + $0x38] sm:$0xff] %v528_v29  }
  0xc4   :  { %v194_v30 = vpop.f32.mrf.mxu2 }
  0xc5   :  { %v548_v31 = vpack.c.bf16 %v194_v30, %v192_v24  ;;  %v214_v32 = vpop.f32.mrf.mxu3 }
  0xc6   :  { %275 = vrot.lane.b32.xlu1 %v169_v16, %s621_s24  ;;  %277 = vrot.lane.b32.xlu2 %v172_v23, %s621_s24  ;;  %v568_v33 = vpack.c.bf16 %v214_v32, %v212_v25 }
  0xc7   :  { %261 = vrot.lane.b32.xlu0 %v152_v22, %s621_s24  ;;  %580 = vst [vmem:[#allocation2 + $0x58] sm:$0xff] %v548_v31  }
  0xc8   :  { %584 = vst [vmem:[#allocation2 + $0x78] sm:$0xff] %v568_v33  }
  0xc9   :  { %454 = dma.vmem_to_hbm [thread:$0]  %s447_s1, 2048, %s449_s27, [#allocation3], %s623_s28, %s623_s28, %s624_s29  }
  0xce   :  { %293 = vrot.lane.b32.xlu1 %v192_v24, %s621_s24  ;;  %295 = vrot.lane.b32.xlu2 %v194_v30, %s621_s24 }
  0xcf   :  { %279 = vrot.lane.b32.xlu0 %v174_v28, %s621_s24 }
  0xd6   :  { %307 = vrot.lane.b32.xlu2 %v209_v20, %s621_s24  ;;  %263 = vrot.lane.b32.xlu1 %v154_v26, %s621_s24 }
  0xd7   :  { %309 = vrot.lane.b32.xlu0 %v212_v25, %s621_s24 }
  0xde   :  { %311 = vrot.lane.b32.xlu1 %v214_v32, %s621_s24 }
  0xe2   :  { %v266_v34 = vpop.permute.xlu2 %265 }
  0xe3   :  { %354 = vst.msk [vmem:[%s929_s3 + $0x40] sm:$0xff] %vm345_vm1, %v266_v34 }
  0xef   :  { %v284_v35 = vpop.permute.xlu2 %283 }
  0xf0   :  { %363 = vst.msk [vmem:[%s929_s3 + $0x88] sm:$0xff] %vm345_vm1, %v284_v35 }
  0xf8   :  { %v302_v36 = vpop.permute.xlu2 %301 }
  0xf9   :  { %372 = vst.msk [vmem:[%s929_s3 + $0xd0] sm:$0xff] %vm345_vm1, %v302_v36  ;;  %v250_v37 = vpop.permute.xlu0 %249 }
  0xfa   :  { %346 = vst.msk [vmem:[%s929_s3] sm:$0xff] %vm345_vm1, %v250_v37 }
  0xff   :  { %v282_v38 = vpop.permute.xlu1 %281 }
 0x100   :  { %362 = vst.msk [vmem:[%s929_s3 + $0x80] sm:$0xff] %vm345_vm1, %v282_v38  ;;  %v272_v39 = vpop.permute.xlu2 %271 }
 0x101   :  { %357 = vst.msk [vmem:[%s929_s3 + $0x58] sm:$0xff] %vm345_vm1, %v272_v39  ;;  %v298_v40 = vpop.permute.xlu0 %297 }
 0x102   :  { %370 = vst.msk [vmem:[%s929_s3 + $0xc0] sm:$0xff] %vm345_vm1, %v298_v40 }
 0x108   :  { %v300_v41 = vpop.permute.xlu1 %299  ;;  %v258_v42 = vpop.permute.xlu2 %257 }
 0x109   :  { %371 = vst.msk [vmem:[%s929_s3 + $0xc8] sm:$0xff] %vm345_vm1, %v300_v41  ;;  %v252_v43 = vpop.permute.xlu0 %251 }
 0x10a   :  { %350 = vst.msk [vmem:[%s929_s3 + $0x20] sm:$0xff] %vm345_vm1, %v258_v42 }
 0x10b   :  { %347 = vst.msk [vmem:[%s929_s3 + $0x8] sm:$0xff] %vm345_vm1, %v252_v43 }
 0x110   :  { %v254_v44 = vpop.permute.xlu1 %253  ;;  %v290_v45 = vpop.permute.xlu2 %289 }
 0x111   :  { %348 = vst.msk [vmem:[%s929_s3 + $0x10] sm:$0xff] %vm345_vm1, %v254_v44  ;;  %v268_v46 = vpop.permute.xlu0 %267 }
 0x112   :  { %366 = vst.msk [vmem:[%s929_s3 + $0xa0] sm:$0xff] %vm345_vm1, %v290_v45 }
 0x113   :  { %355 = vst.msk [vmem:[%s929_s3 + $0x48] sm:$0xff] %vm345_vm1, %v268_v46 }
 0x118   :  { %v270_v47 = vpop.permute.xlu1 %269  ;;  %v260_v48 = vpop.permute.xlu2 %259 }
 0x119   :  { %356 = vst.msk [vmem:[%s929_s3 + $0x50] sm:$0xff] %vm345_vm1, %v270_v47  ;;  %v286_v49 = vpop.permute.xlu0 %285 }
 0x11a   :  { %351 = vst.msk [vmem:[%s929_s3 + $0x28] sm:$0xff] %vm345_vm1, %v260_v48 }
 0x11b   :  { %364 = vst.msk [vmem:[%s929_s3 + $0x90] sm:$0xff] %vm345_vm1, %v286_v49 }
 0x120   :  { %v256_v50 = vpop.permute.xlu1 %255  ;;  %v278_v51 = vpop.permute.xlu2 %277 }
 0x121   :  { %349 = vst.msk [vmem:[%s929_s3 + $0x18] sm:$0xff] %vm345_vm1, %v256_v50  ;;  %v304_v52 = vpop.permute.xlu0 %303 }
 0x122   :  { %360 = vst.msk [vmem:[%s929_s3 + $0x70] sm:$0xff] %vm345_vm1, %v278_v51 }
 0x123   :  { %373 = vst.msk [vmem:[%s929_s3 + $0xd8] sm:$0xff] %vm345_vm1, %v304_v52 }
 0x128   :  { %v288_v53 = vpop.permute.xlu1 %287  ;;  %v296_v54 = vpop.permute.xlu2 %295 }
 0x129   :  { %365 = vst.msk [vmem:[%s929_s3 + $0x98] sm:$0xff] %vm345_vm1, %v288_v53  ;;  %v274_v55 = vpop.permute.xlu0 %273 }
 0x12a   :  { %369 = vst.msk [vmem:[%s929_s3 + $0xb8] sm:$0xff] %vm345_vm1, %v296_v54 }
 0x12b   :  { %358 = vst.msk [vmem:[%s929_s3 + $0x60] sm:$0xff] %vm345_vm1, %v274_v55 }
 0x130   :  { %v306_v56 = vpop.permute.xlu1 %305  ;;  %v308_v57 = vpop.permute.xlu2 %307 }
 0x131   :  { %374 = vst.msk [vmem:[%s929_s3 + $0xe0] sm:$0xff] %vm345_vm1, %v306_v56  ;;  %v292_v58 = vpop.permute.xlu0 %291 }
 0x132   :  { %375 = vst.msk [vmem:[%s929_s3 + $0xe8] sm:$0xff] %vm345_vm1, %v308_v57 }
 0x133   :  { %367 = vst.msk [vmem:[%s929_s3 + $0xa8] sm:$0xff] %vm345_vm1, %v292_v58 }
 0x138   :  { %v276_v59 = vpop.permute.xlu1 %275 }
 0x139   :  { %359 = vst.msk [vmem:[%s929_s3 + $0x68] sm:$0xff] %vm345_vm1, %v276_v59  ;;  %v262_v60 = vpop.permute.xlu0 %261 }
 0x13a   :  { %352 = vst.msk [vmem:[%s929_s3 + $0x30] sm:$0xff] %vm345_vm1, %v262_v60 }
 0x140   :  { %v294_v61 = vpop.permute.xlu1 %293 }
 0x141   :  { %368 = vst.msk [vmem:[%s929_s3 + $0xb0] sm:$0xff] %vm345_vm1, %v294_v61  ;;  %v280_v62 = vpop.permute.xlu0 %279 }
 0x142   :  { %361 = vst.msk [vmem:[%s929_s3 + $0x78] sm:$0xff] %vm345_vm1, %v280_v62 }
 0x148   :  { %v264_v63 = vpop.permute.xlu1 %263 }
 0x149   :  { %353 = vst.msk [vmem:[%s929_s3 + $0x38] sm:$0xff] %vm345_vm1, %v264_v63  ;;  %v310_v0 = vpop.permute.xlu0 %309 }
 0x14a   :  { %376 = vst.msk [vmem:[%s929_s3 + $0xf0] sm:$0xff] %vm345_vm1, %v310_v0 }
 0x150   :  { %v312_v1 = vpop.permute.xlu1 %311 }
 0x151   :  { %377 = vst.msk [vmem:[%s929_s3 + $0xf8] sm:$0xff] %vm345_vm1, %v312_v1 }
 0x152   :  { %619 = dma.done.wait [#allocation3], 2048  }
 0x153   :  { %620 = vsyncadd [#allocation3], 4294965248 }
 0x154   :  { %463 = vsyncpa [#allocation3], 1 }

</bundles_post_ra>
